<compile_context>
chip_gen: v6e
topology: v6e:2x2x1
jax: 0.10.0
libtpu: 0.0.40
codegen_flags: <defaults>
</compile_context>

<pallas_src>
import jax
import jax.numpy as jnp
from jax.experimental import pallas as pl
from jax.experimental.pallas import tpu as pltpu


# Conservative across generations: v7x has 64 MiB physical VMEM / TC, so keep the
# scoped limit well under 32 MiB; this also raises v5e above its 16 MiB default.
_VMEM_LIMIT_BYTES = 28 * 1024 * 1024
# Per-batch slab threshold for the single-pass path: in+out, double-buffered
# => ~4x the slab, safely under the scoped limit on every generation.
_SINGLE_PASS_MAX_SLAB_BYTES = 4 * 1024 * 1024


def _round_up(n, m):
    return ((n + m - 1) // m) * m


# ----------------------------------------------------------------------------
# Single-pass fused kernel: mean + projection + gate in one read of x.
# ----------------------------------------------------------------------------
def _psa_fused_kernel(x_ref, wq_t_ref, bq_ref, wv_t_ref, bv_ref, o_ref):
    # x_ref:    (1, C, HW)  native dtype, C on sublanes, HW on lanes
    # wq_t_ref: (C, C2) f32   (Wq transposed)      bq_ref: (1, C2) f32
    # wv_t_ref: (C, C2) f32   (Wv transposed)      bv_ref: (1, C2) f32
    x = x_ref[0]                                                    # (C, HW)
    inv_hw = 1.0 / x.shape[1]

    # Spatial mean with f32 accumulation, no f32 copy of the tile.
    m = jnp.sum(x, axis=1, keepdims=True, dtype=jnp.float32) * inv_hw       # (C, 1)

    # Tiny projection done with broadcast-multiplies + cross-sublane/lane reduces
    # (no matmuls / transposes in-kernel -> robust at any C, C2).
    q = jnp.sum(wq_t_ref[...] * m, axis=0, keepdims=True) + bq_ref[...]     # (1, C2)
    v = jnp.sum(wv_t_ref[...] * q, axis=1, keepdims=True)                   # (C, 1)
    s = jnp.sum(bv_ref[...] * q, axis=1, keepdims=True)                     # (1, 1)

    # wz[p] = v . x[:, p] + s : multiply in x.dtype (no full-tile f32 upcast),
    # accumulate the sublane reduction in f32.
    wz = jnp.sum(v.astype(x.dtype) * x, axis=0, keepdims=True,
                 dtype=jnp.float32) + s                                     # (1, HW)
    gate = jax.nn.sigmoid(wz).astype(x.dtype)                               # (1, HW)
    o_ref[0] = gate * x


def _psa_single_pass(x_flat, wq_mat, bq_f, wv_mat, bv_f):
    b, c, hw = x_flat.shape
    c2 = wq_mat.shape[0]
    itemsize = jnp.dtype(x_flat.dtype).itemsize

    wq_t = wq_mat.T                       # (C, C2): reduce over sublanes -> q row
    wv_t = wv_mat.T                       # (C, C2): reduce over lanes    -> v column
    bq_row = bq_f.reshape(1, c2)
    bv_row = bv_f.reshape(1, c2)

    cost = pl.CostEstimate(
        flops=4 * b * c * hw,                         # mean + gate logit + scale
        transcendentals=b * hw,                       # one sigmoid per position
        bytes_accessed=2 * b * c * hw * itemsize,     # read x once, write out once
    )

    return pl.pallas_call(
        _psa_fused_kernel,
        out_shape=jax.ShapeDtypeStruct((b, c, hw), x_flat.dtype),
        grid_spec=pltpu.PrefetchScalarGridSpec(
            num_scalar_prefetch=0,
            grid=(b,),
            in_specs=[
                pl.BlockSpec((1, c, hw), lambda i: (i, 0, 0)),
                pl.BlockSpec((c, c2), lambda i: (0, 0)),
                pl.BlockSpec((1, c2), lambda i: (0, 0)),
                pl.BlockSpec((c, c2), lambda i: (0, 0)),
                pl.BlockSpec((1, c2), lambda i: (0, 0)),
            ],
            out_specs=pl.BlockSpec((1, c, hw), lambda i: (i, 0, 0)),
        ),
        compiler_params=pltpu.CompilerParams(
            dimension_semantics=("parallel",),
            vmem_limit_bytes=_VMEM_LIMIT_BYTES),
        cost_estimate=cost,
    )(x_flat, wq_t, bq_row, wv_t, bv_row)


# ----------------------------------------------------------------------------
# Multi-pass path: XLA computes the pooled mean / projection, a tiled kernel
# applies the gate.  Used for large per-batch slabs or batch == 1.
# ----------------------------------------------------------------------------
def _psa_apply_kernel(x_ref, v_ref, s_ref, o_ref):
    # x_ref: (1, C, T) tile; v_ref: (1, C, 1) f32; s_ref: (1, 1, 1) f32.
    x = x_ref[0]                                                    # (C, T)
    v = v_ref[0]                                                    # (C, 1)
    s = s_ref[0]                                                    # (1, 1)
    # Multiply in x.dtype, accumulate the sublane reduce in f32 (no full upcast).
    wz = jnp.sum(v.astype(x.dtype) * x, axis=0, keepdims=True,
                 dtype=jnp.float32) + s                             # (1, T)
    gate = jax.nn.sigmoid(wz).astype(x.dtype)
    o_ref[0] = gate * x


def _pick_hw_tile(hw, c, itemsize, batch, max_block_bytes=4 * 1024 * 1024):
    """Lane tile (multiple of 128) for the tiled apply kernel.

    Grid uses pl.cdiv(hw, tile): the last tile may be ragged; Pallas masks the
    out-of-bounds lanes, and the per-lane gate never mixes lanes, so this is safe.
    """
    # Keep each per-channel strided DMA chunk >= ~512 B (HBM efficiency).
    min_tile = 256 if itemsize < 4 else 128
    budget_tile = min_tile
    for t in (8192, 4096, 2048, 1024, 512, 256, 128):
        if t < min_tile:
            break
        if c * t * itemsize <= max_block_bytes:
            budget_tile = t
            break
    # Don't pick a tile far larger than HW itself (wasted padded DMA/compute).
    tile = min(budget_tile, max(min_tile, _round_up(hw, 128)))
    # v7x megacore occupancy: with batch == 1, keep >= 2 parallel HW tiles.
    if batch == 1:
        tile = min(tile, max(min_tile, _round_up((hw + 1) // 2, 128)))
    return tile


def _psa_multi_pass(x_flat, wq_mat, bq_f, wv_mat, bv_f):
    b, c, hw = x_flat.shape
    itemsize = jnp.dtype(x_flat.dtype).itemsize

    # Pooled query + fused gating vector.  dtype= fuses the f32 accumulation into
    # the reduction (no materialised f32 copy of x for sub-32-bit inputs).
    x_mean = jnp.mean(x_flat, axis=2, dtype=jnp.float32)            # (B, C)
    q = x_mean @ wq_mat.T + bq_f                                    # (B, C2)
    v = q @ wv_mat                                                  # (B, C)   = Wv^T q
    s = q @ bv_f                                                    # (B,)     = q . bv
    v3 = v[:, :, None]                                              # (B, C, 1)
    s3 = s[:, None, None]                                           # (B, 1, 1)

    tile = _pick_hw_tile(hw, c, itemsize, batch=b)
    grid = (b, pl.cdiv(hw, tile))

    cost = pl.CostEstimate(
        flops=3 * b * c * hw,
        transcendentals=b * hw,
        bytes_accessed=2 * b * c * hw * itemsize,
    )

    return pl.pallas_call(
        _psa_apply_kernel,
        out_shape=jax.ShapeDtypeStruct((b, c, hw), x_flat.dtype),
        grid_spec=pltpu.PrefetchScalarGridSpec(
            num_scalar_prefetch=0,
            grid=grid,
            in_specs=[
                pl.BlockSpec((1, c, tile), lambda i, j: (i, 0, j)),
                pl.BlockSpec((1, c, 1), lambda i, j: (i, 0, 0)),
                pl.BlockSpec((1, 1, 1), lambda i, j: (i, 0, 0)),
            ],
            out_specs=pl.BlockSpec((1, c, tile), lambda i, j: (i, 0, j)),
        ),
        compiler_params=pltpu.CompilerParams(
            dimension_semantics=("parallel", "parallel"),
            vmem_limit_bytes=_VMEM_LIMIT_BYTES),
        cost_estimate=cost,
    )(x_flat, v3, s3)


# ----------------------------------------------------------------------------
# Public wrapper
# ----------------------------------------------------------------------------
def psa_spatial_module(x_nchw, wv, bv, wq, bq):
    """x_nchw: (B, C, H, W); wv/wq: (C//2, C, 1, 1) 1x1-conv weights; bv/bq: (C//2,)."""
    b, c, h, w = x_nchw.shape
    c2 = c // 2
    hw = h * w

    x_flat = x_nchw.reshape(b, c, hw)                               # free reshape
    wv_mat = wv.reshape(c2, c).astype(jnp.float32)
    wq_mat = wq.reshape(c2, c).astype(jnp.float32)
    bv_f = bv.astype(jnp.float32)
    bq_f = bq.astype(jnp.float32)

    slab_bytes = c * hw * jnp.dtype(x_flat.dtype).itemsize
    # Single-pass when the per-batch slab fits VMEM AND batch >= 2 (so a v7x
    # megacore still has >= 2 parallel grid steps).  With batch == 1 we prefer
    # the HW-tiled multi-pass path, which feeds both TensorCores on v7x.
    if slab_bytes <= _SINGLE_PASS_MAX_SLAB_BYTES and b >= 2:
        out_flat = _psa_single_pass(x_flat, wq_mat, bq_f, wv_mat, bv_f)
    else:
        out_flat = _psa_multi_pass(x_flat, wq_mat, bq_f, wv_mat, bv_f)
    return out_flat.reshape(b, c, h, w)


def psa_spatial_reference(x, wv, bv, wq, bq):
    """Pure-JAX reference mirroring the PyTorch forward exactly (NCHW)."""
    b, c, h, w = x.shape
    c2 = c // 2
    wv_mat = wv.reshape(c2, c)
    wq_mat = wq.reshape(c2, c)
    sp_wv = jnp.einsum("bchw,oc->bohw", x, wv_mat) + bv[None, :, None, None]
    sp_wq = jnp.einsum("bchw,oc->bohw", x, wq_mat) + bq[None, :, None, None]
    sp_wq = jnp.mean(sp_wq, axis=(2, 3), keepdims=True)             # (B, C2, 1, 1)
    sp_wv = sp_wv.reshape(b, c2, -1)                                 # (B, C2, HW)
    sp_wq = jnp.transpose(sp_wq, (0, 2, 3, 1)).reshape(b, 1, c2)     # (B, 1, C2)
    wz = jnp.matmul(sp_wq, sp_wv)                                    # (B, 1, HW)
    weight = jax.nn.sigmoid(wz.reshape(b, 1, h, w))
    return weight * x


if __name__ == "__main__":
    key = jax.random.PRNGKey(0)
    b, c, h, w = 2, 4, 16, 16
    c2 = c // 2

    k_x, k_wv, k_bv, k_wq, k_bq = jax.random.split(key, 5)
    x = jax.random.normal(k_x, (b, c, h, w), dtype=jnp.float32)

    bound = 1.0 / (c ** 0.5)
    wv = jax.random.uniform(k_wv, (c2, c, 1, 1), minval=-bound, maxval=bound)
    bv = jax.random.uniform(k_bv, (c2,), minval=-bound, maxval=bound)
    wq = jax.random.uniform(k_wq, (c2, c, 1, 1), minval=-bound, maxval=bound)
    bq = jax.random.uniform(k_bq, (c2,), minval=-bound, maxval=bound)

    ref = psa_spatial_reference(x, wv, bv, wq, bq)

    # Main entry (takes the single-pass fused path at this shape / batch).
    out = jax.block_until_ready(psa_spatial_module(x, wv, bv, wq, bq))
    assert out.shape == (b, c, h, w)
    assert jnp.allclose(out, ref, atol=2e-5, rtol=2e-5), "single-pass mismatch"

    # Also exercise the tiled multi-pass path (used for large slabs / batch == 1).
    out_mp = _psa_multi_pass(
        x.reshape(b, c, h * w),
        wq.reshape(c2, c).astype(jnp.float32), bq.astype(jnp.float32),
        wv.reshape(c2, c).astype(jnp.float32), bv.astype(jnp.float32))
    out_mp = jax.block_until_ready(out_mp).reshape(b, c, h, w)
    assert jnp.allclose(out_mp, ref, atol=2e-5, rtol=2e-5), "multi-pass mismatch"

    print("KERNEL_OK")
</pallas_src>

<mosaic_0001>
module attributes {stable_mosaic.version = 11 : i64} {
  func.func @_psa_fused_kernel(%arg0: i32, %arg1: memref<1x4x256xf32, #tpu.memory_space<vmem>>, %arg2: memref<4x2xf32, #tpu.memory_space<vmem>>, %arg3: memref<1x2xf32, #tpu.memory_space<vmem>>, %arg4: memref<4x2xf32, #tpu.memory_space<vmem>>, %arg5: memref<1x2xf32, #tpu.memory_space<vmem>>, %arg6: memref<1x4x256xf32, #tpu.memory_space<vmem>>) attributes {dimension_semantics = [#tpu.dimension_semantics<parallel>], iteration_bounds = array<i64: 2>, scalar_prefetch = 0 : i64, scratch_operands = 0 : i64, tpu.core_type = #tpu.core_type<tc>, window_params = [{transform_indices = @transform_0, window_bounds = array<i64: 1, 4, 256>}, {pipeline_mode = #tpu.pipeline_mode<synchronous>, transform_indices = @transform_1, window_bounds = array<i64: 4, 2>}, {pipeline_mode = #tpu.pipeline_mode<synchronous>, transform_indices = @transform_2, window_bounds = array<i64: 1, 2>}, {pipeline_mode = #tpu.pipeline_mode<synchronous>, transform_indices = @transform_3, window_bounds = array<i64: 4, 2>}, {pipeline_mode = #tpu.pipeline_mode<synchronous>, transform_indices = @transform_4, window_bounds = array<i64: 1, 2>}, {transform_indices = @transform_5, window_bounds = array<i64: 1, 4, 256>}]} {
    %c0 = arith.constant 0 : index
    %c0_0 = arith.constant 0 : index
    %c0_1 = arith.constant 0 : index
    %0 = vector.load %arg1[%c0, %c0_0, %c0_1] : memref<1x4x256xf32, #tpu.memory_space<vmem>>, vector<1x4x256xf32>
    %1 = vector.shape_cast %0 : vector<1x4x256xf32> to vector<4x256xf32>
    %cst = arith.constant dense<0.000000e+00> : vector<4xf32>
    %2 = vector.multi_reduction <add>, %1, %cst [1] : vector<4x256xf32> to vector<4xf32>
    %3 = vector.shape_cast %2 : vector<4xf32> to vector<4x1xf32>
    %cst_2 = arith.constant 3.906250e-03 : f32
    %4 = vector.broadcast %cst_2 : f32 to vector<4x1xf32>
    %5 = arith.mulf %3, %4 : vector<4x1xf32>
    %c0_3 = arith.constant 0 : index
    %c0_4 = arith.constant 0 : index
    %6 = vector.load %arg2[%c0_3, %c0_4] : memref<4x2xf32, #tpu.memory_space<vmem>>, vector<4x2xf32>
    %7 = vector.broadcast %5 : vector<4x1xf32> to vector<4x2xf32>
    %8 = arith.mulf %6, %7 : vector<4x2xf32>
    %cst_5 = arith.constant dense<0.000000e+00> : vector<2xf32>
    %9 = vector.multi_reduction <add>, %8, %cst_5 [0] : vector<4x2xf32> to vector<2xf32>
    %10 = vector.shape_cast %9 : vector<2xf32> to vector<1x2xf32>
    %c0_6 = arith.constant 0 : index
    %c0_7 = arith.constant 0 : index
    %11 = vector.load %arg3[%c0_6, %c0_7] : memref<1x2xf32, #tpu.memory_space<vmem>>, vector<1x2xf32>
    %12 = arith.addf %10, %11 : vector<1x2xf32>
    %c0_8 = arith.constant 0 : index
    %c0_9 = arith.constant 0 : index
    %13 = vector.load %arg4[%c0_8, %c0_9] : memref<4x2xf32, #tpu.memory_space<vmem>>, vector<4x2xf32>
    %14 = vector.broadcast %12 : vector<1x2xf32> to vector<4x2xf32>
    %15 = arith.mulf %13, %14 : vector<4x2xf32>
    %cst_10 = arith.constant dense<0.000000e+00> : vector<4xf32>
    %16 = vector.multi_reduction <add>, %15, %cst_10 [1] : vector<4x2xf32> to vector<4xf32>
    %17 = vector.shape_cast %16 : vector<4xf32> to vector<4x1xf32>
    %c0_11 = arith.constant 0 : index
    %c0_12 = arith.constant 0 : index
    %18 = vector.load %arg5[%c0_11, %c0_12] : memref<1x2xf32, #tpu.memory_space<vmem>>, vector<1x2xf32>
    %19 = arith.mulf %18, %12 : vector<1x2xf32>
    %cst_13 = arith.constant dense<0.000000e+00> : vector<1xf32>
    %20 = vector.multi_reduction <add>, %19, %cst_13 [1] : vector<1x2xf32> to vector<1xf32>
    %21 = vector.shape_cast %20 : vector<1xf32> to vector<1x1xf32>
    %22 = vector.broadcast %17 : vector<4x1xf32> to vector<4x256xf32>
    %23 = arith.mulf %22, %1 : vector<4x256xf32>
    %cst_14 = arith.constant dense<0.000000e+00> : vector<256xf32>
    %24 = vector.multi_reduction <add>, %23, %cst_14 [0] : vector<4x256xf32> to vector<256xf32>
    %25 = vector.shape_cast %24 : vector<256xf32> to vector<1x256xf32>
    %26 = vector.broadcast %21 : vector<1x1xf32> to vector<1x256xf32>
    %27 = arith.addf %25, %26 : vector<1x256xf32>
    %28 = arith.negf %27 : vector<1x256xf32>
    %29 = math.exp %28 : vector<1x256xf32>
    %cst_15 = arith.constant 1.000000e+00 : f32
    %30 = vector.broadcast %cst_15 : f32 to vector<1x256xf32>
    %31 = arith.addf %30, %29 : vector<1x256xf32>
    %32 = arith.divf %30, %31 : vector<1x256xf32>
    %33 = vector.broadcast %32 : vector<1x256xf32> to vector<4x256xf32>
    %34 = arith.mulf %33, %1 : vector<4x256xf32>
    %c0_16 = arith.constant 0 : index
    %c0_17 = arith.constant 0 : index
    %c0_18 = arith.constant 0 : index
    %35 = vector.load %arg6[%c0_16, %c0_17, %c0_18] : memref<1x4x256xf32, #tpu.memory_space<vmem>>, vector<1x4x256xf32>
    %36 = vector.shape_cast %35 : vector<1x4x256xf32> to vector<4x256xf32>
    %37 = vector.shape_cast %34 : vector<4x256xf32> to vector<1x4x256xf32>
    tpu.vector_store %arg6[%c0_16, %c0_17, %c0_18], %37 {strides = array<i32>} : memref<1x4x256xf32, #tpu.memory_space<vmem>>, vector<1x4x256xf32>,
    return
  }
  func.func @transform_0(%arg0: i32) -> (i32, i32, i32) {
    %c0_i32 = arith.constant 0 : i32
    %c0_i32_0 = arith.constant 0 : i32
    %c0_i32_1 = arith.constant 0 : i32
    return %arg0, %c0_i32, %c0_i32_0 : i32, i32, i32
  }
  func.func @transform_1(%arg0: i32) -> (i32, i32) {
    %c0_i32 = arith.constant 0 : i32
    %c0_i32_0 = arith.constant 0 : i32
    %c0_i32_1 = arith.constant 0 : i32
    return %c0_i32, %c0_i32_0 : i32, i32
  }
  func.func @transform_2(%arg0: i32) -> (i32, i32) {
    %c0_i32 = arith.constant 0 : i32
    %c0_i32_0 = arith.constant 0 : i32
    %c0_i32_1 = arith.constant 0 : i32
    return %c0_i32, %c0_i32_0 : i32, i32
  }
  func.func @transform_3(%arg0: i32) -> (i32, i32) {
    %c0_i32 = arith.constant 0 : i32
    %c0_i32_0 = arith.constant 0 : i32
    %c0_i32_1 = arith.constant 0 : i32
    return %c0_i32, %c0_i32_0 : i32, i32
  }
  func.func @transform_4(%arg0: i32) -> (i32, i32) {
    %c0_i32 = arith.constant 0 : i32
    %c0_i32_0 = arith.constant 0 : i32
    %c0_i32_1 = arith.constant 0 : i32
    return %c0_i32, %c0_i32_0 : i32, i32
  }
  func.func @transform_5(%arg0: i32) -> (i32, i32, i32) {
    %c0_i32 = arith.constant 0 : i32
    %c0_i32_0 = arith.constant 0 : i32
    %c0_i32_1 = arith.constant 0 : i32
    return %arg0, %c0_i32, %c0_i32_0 : i32, i32, i32
  }
}

</mosaic_0001>

<bundles_post_ra>
// kernel: tpu_custom_call.1
= control target key start
LH: loop header
LB: loop body
LE: loop exit
PB: predicated region body
PF: predicated region fallthrough
CT: control target
= control target key end

     0   :  { %10 = vsyncpa [#allocation3], 0  ;;  %s783_s0 = inlined_call_operand.hbm [shape: f32[2,4,256], index: 0, kind: input, shape index: {}]   ;;  %s784_s1 = inlined_call_operand.vmem [shape: f32[4,2], index: 1, kind: input, shape index: {}]   ;;  %s785_s2 = inlined_call_operand.vmem [shape: f32[1,2], index: 2, kind: input, shape index: {}]   ;;  %s786_s3 = inlined_call_operand.vmem [shape: f32[4,2], index: 3, kind: input, shape index: {}]   ;;  %s787_s4 = inlined_call_operand.vmem [shape: f32[1,2], index: 4, kind: input, shape index: {}]   ;;  %s788_s5 = inlined_call_operand.hbm [shape: f32[2,4,256], index: 5, kind: output, shape index: {}]  }
   0x1   :  { %12 = vsyncpa [#allocation3 + $0x1], 0 }
   0x2   :  { %13 = vsyncpa [#allocation4], 0 }
   0x3   :  { %15 = vsyncpa [#allocation4 + $0x1], 0  ;;  %s608_s18 = smov 0   ;;  %s610_s19 = smov 0  }
   0x4   :  { %s612_s20 = smov 0   ;;  %s614_s21 = smov 0  }
   0x5 LB: > { %s629_s22 = sadd.s32 4294967295, %s574_s21   ;;  %s409_s23 = sadd.s32 4294967294, %s574_s21   ;;  %s574_s21 = sphi %s614_s21, %s805_s21   ;;  %s570_s20 = sphi %s612_s20, %s804_s20   ;;  %s566_s19 = sphi %s610_s19, %s803_s19   ;;  %s562_s18 = sphi %s608_s18, %s802_s18  }
   0x6   : > { %s633_s24 = sadd.s32 1, %s574_s21   ;;  %s28_s25 = sadd.s32 1, %s570_s20 }
   0x7   : > { %s25_s26 = ssub.s32 %s574_s21, %s633_s24  ;;  %p35_p0 = scmp.ne.s32.totalorder %s570_s20, %s566_s19 }
   0x8   : > { %p26_p1 = scmp.eq.s32.totalorder %s25_s26, 0  ;;  %p36_p2 = scmp.eq.s32.totalorder %s574_s21, 0 }
   0x9   : > { %p41_p3 = scmp.ne.s32.totalorder %s566_s19, %s562_s18  ;;  %p42_p4 = scmp.eq.s32.totalorder %s629_s22, 0 }
   0xa   : > { %s645_s27 = scalar_select %p26_p1, %s570_s20, %s28_s25  }
   0xb   : > { %p647_p5 = por %p36_p2, %p35_p0  ;;  %p651_p6 = por %p42_p4, %p41_p3 }
   0xc   : > { %p149_p7 = scmp.eq.s32.totalorder %s629_s22, 1  ;;  %p155_p8 = scmp.eq.s32.totalorder %s409_s23, 1 }
   0xd   : > { %s792_s29 = scalar_select %p651_p6, 1, 0 }
   0xe   : > { %p439_p10 = scmp.lt.s32.totalorder %s574_s21, 2  ;;  %p658_p11 = por %p149_p7, %p35_p0 }
   0xf   : > { %p662_p12 = por %p155_p8, %p41_p3  ;;  %s187_s7 = sand.u32 1, %s570_s20  }
  0x10   : > { %s793_s30 = scalar_select %p658_p11, 1, 0 }
  0x11   : > { %s794_s6 = scalar_select %p662_p12, 1, 0 }
  0x12   : > { %s425_s8 = sshll.u32 %s574_s21, 7  ;;  %s412_s9 = sshll.u32 %s187_s7, 3 }
  0x13   : > { %s671_s12 = scalar_lea.hbm %s783_s0, %s425_s8  ;;  %s191_s13 = scalar_lea.vmem [#allocation2], %s412_s9 }
  0x14   : > { %s199_s14 = sshll.u32 %s191_s13, 4  ;;  %p675_p13 = pnand %p439_p10, %p647_p5  ;;  %s679_s14 = int_to_ptr.vmem [resolvable:$true] %s199_s14 }
  0x15   : > { %s188_s16 = scalar_lea.sflag [#allocation3], %s187_s7  ;;  %s482_s17 = scalar_lea.hbm %s671_s12, 128 }
  0x16   : > { %p483_p2 = scmp.ne.s32.totalorder %s671_s12, %s482_s17  ;;  %p484_p3 = pneg %p675_p13 }
  0x17   : > { %s487_s26 = scalar_lea.hbm %s783_s0, 256  ;;  %p488_p5 = scmp.lt.s32.totalorder %s671_s12, %s783_s0 }
  0x18   : > { %p485_p4 = pnand %p484_p3, %p483_p2  ;;  %p489_p8 = scmp.lt.s32.totalorder %s487_s26, %s482_s17 }
  0x1a   : > { %p486_p7 = pneg %p485_p4  ;;  %p490_p10 = por %p489_p8, %p488_p5 }
  0x1c   : > { %p491_p9 = pnand %p490_p10, %p486_p7 }
  0x1e   : > { %494 = shalt.err (!%p491_p9)
}
  0x1f   : > { %s495_s7 = scalar_lea.vmem %s679_s14, 128  ;;  %s576_s9 = smov [#allocation2]  }
  0x20   : > { %p496_p0 = scmp.ne.s32.totalorder %s679_s14, %s495_s7  ;;  %s500_s10 = sshll.u32 %s576_s9, 4  ;;  %s501_s10 = int_to_ptr.vmem [resolvable:$false] %s500_s10 }
  0x21   : > { %s502_s11 = scalar_lea.vmem %s501_s10, 256  ;;  %p503_p4 = scmp.lt.s32.totalorder %s679_s14, %s501_s10 }
  0x22   : > { %p498_p1 = pnand %p496_p0, %p484_p3  ;;  %p504_p12 = scmp.lt.s32.totalorder %s502_s11, %s495_s7 }
  0x24   : > { %p499_p2 = pneg %p498_p1  ;;  %p505_p11 = por %p504_p12, %p503_p4 }
  0x26   : > { %p506_p6 = pnand %p505_p11, %p499_p2 }
  0x28   : > { %509 = shalt.err (!%p506_p6)
}
  0x29   : > { %434 = dma.hbm_to_vmem [thread:$0]  (!%p675_p13), %s671_s12, 128, %s679_s14, %s188_s16  }
  0x2a   : > { %p796_p9 = scmp.lt.s32.totalorder %s574_s21, 3  ;;  %p797_p7 = scmp.ge.s32.totalorder %s574_s21, 1 }
  0x2c   : > { %p205_p0 = pnand %p797_p7, %p796_p9 }
  0x2d   : > { %s706_s13 = sand.u32 (!%p205_p0), 1, %s566_s19   ;;  %p798_p6 = scmp.ne.s32.totalorder (!%p205_p0), %s792_s29, 0 }
  0x2e   : > { %208 = sbr.rel (%p205_p0) target bundleno = 427 (0x1ab), region = 40  ;;  %s416_s17 = sshll.u32 (!%p205_p0), %s706_s13, 3 }
  0x2f   : > { %s211_s23 = scalar_lea.sflag (!%p205_p0), [#allocation3], %s706_s13  ;;  %s214_s15 = scalar_lea.vmem (!%p205_p0), [#allocation2], %s416_s17 }
  0x33   : > { %553 = dma.done.wait (%p798_p6), %s211_s23, 128  }
  0x34   : > { %555 = vsyncadd (%p798_p6), %s211_s23, 4294967168  ;;  %vm245_vm0 = vcmask 1043456   ;;  %v716_v0 = vld [vmem:[%s214_s15] sm:$0xff]  ;;  %vm254_vm1 = vcmask 11264   ;;  %v265_v12 = vlaneseq  ;;  %vm275_vm2 = vcmask 8192   ;;  %s426_s7 = sshll.u32 %s629_s22, 7 }
  0x35   : > { %v720_v1 = vcombine.high %v716_v0, %v716_v0  ;;  %v246_v2 = vsel %vm245_vm0, %v716_v0, 0.0  ;;  %v252_v5 = vld [vmem:[%s784_s1] sm:$0xf]  ;;  %s240_s9 = scalar_lea.vmem [#allocation5], %s416_s17  ;;  %s337_s15 = scalar_lea.hbm %s788_s5, %s426_s7 }
  0x36   : > { %v266_v15 = vshrl.u32 %v265_v12, 7  ;;  %v262_v17 = vld [vmem:[%s785_s2] sm:$0x1]  ;;  %s339_s10 = sshll.u32 %s240_s9, 4  ;;  %s325_s12 = scalar_lea.sflag [#allocation4], %s706_s13  ;;  %s340_s10 = int_to_ptr.vmem [resolvable:$true] %s339_s10 }
  0x37   : > { %v247_v3 = vsel %vm245_vm0, %v720_v1, 0.0  ;;  %v273_v20 = vld [vmem:[%s787_s4] sm:$0x1]  ;;  %s510_s14 = scalar_lea.vmem %s340_s10, 128  ;;  %p799_p12 = scmp.ne.s32.totalorder %s793_s30, 0 }
  0x38   : > { %v248_v4 = vadd.f32 %v247_v3, %v246_v2  ;;  %v267_v19 = vsub.s32 0, %v266_v15  ;;  %v264_v22 = vld [vmem:[%s786_s3] sm:$0xf]  ;;  %p511_p11 = scmp.ne.s32.totalorder %s340_s10, %s510_s14  ;;  %s577_s29 = smov [#allocation5]  }
  0x39   : > { %s514_s22 = sshll.u32 %s577_s29, 4  ;;  %s515_s22 = int_to_ptr.vmem [resolvable:$false] %s514_s22 }
  0x3a   : > { %249 = vadd.xlane.f32.xlu0 %v248_v4  ;;  %p512_p13 = pnand %p511_p11, %p799_p12  ;;  %s516_s17 = scalar_lea.vmem %s515_s22, 256 }
  0x3b   : > { %p517_p3 = scmp.lt.s32.totalorder %s340_s10, %s515_s22  ;;  %p518_p5 = scmp.lt.s32.totalorder %s516_s17, %s510_s14 }
  0x3c   : > { %p513_p1 = pneg %p512_p13 }
  0x3d   : > { %p519_p8 = por %p518_p5, %p517_p3 }
  0x3f   : > { %p520_p10 = pnand %p519_p8, %p513_p1 }
  0xc3   : > { %v250_v6 = vpop.xlane.xlu0 %249 }
  0xc4   : > { %v251_v7 = vmul.f32 0.00390625, %v250_v6 }
  0xc6   : > { %v253_v8 = vmul.f32 %v252_v5, %v251_v7 }
  0xc8   : > { %v255_v9 = vsel %vm254_vm1, %v253_v8, 0.0 }
  0xc9   : > { %v256_v10 = vrot.slane %v255_v9, 4 }
  0xcb   : > { %v257_v11 = vadd.f32 %v256_v10, %v255_v9 }
  0xcd   : > { %v258_v13 = vrot.slane %v257_v11, 2 }
  0xcf   : > { %v259_v14 = vadd.f32 %v258_v13, %v257_v11 }
  0xd1   : > { %v260_v16 = vrot.slane %v259_v14, 1 }
  0xd3   : > { %v261_v18 = vadd.f32 %v260_v16, %v259_v14 }
  0xd5   : > { %v263_v21 = vadd.f32 %v262_v17, %v261_v18 }
  0xd7   : > { %v274_v23 = vmul.f32 %v273_v20, %v263_v21  ;;  %v268_v24 = vrot.slane %v263_v21, %v267_v19 }
  0xd9   : > { %v276_v25 = vsel %vm275_vm2, %v274_v23, 0.0  ;;  %v269_v26 = vmul.f32 %v268_v24, %v264_v22 }
  0xda   : > { %277 = vadd.xlane.f32.xlu1 %v276_v25 }
  0xdb   : > { %v270_v27 = vsel %vm254_vm1, %v269_v26, 0.0 }
  0xdc   : > { %271 = vadd.xlane.f32.xlu0 %v270_v27 }
 0x163   : > { %v278_v45 = vpop.xlane.xlu1 %277 }
 0x165   : > { %v272_v28 = vpop.xlane.xlu0 %271 }
 0x166   : > { %v279_v29 = vmul.f32 %v272_v28, %v716_v0  ;;  %v280_v30 = vmul.f32 %v272_v28, %v720_v1 }
 0x168   : > { %v281_v31 = vsel %vm245_vm0, %v279_v29, 0.0  ;;  %v288_v32 = vsel %vm245_vm0, %v280_v30, 0.0 }
 0x169   : > { %v282_v33 = vrot.slane %v281_v31, 4  ;;  %v289_v34 = vrot.slane %v288_v32, 4 }
 0x16b   : > { %v283_v35 = vadd.f32 %v282_v33, %v281_v31  ;;  %v290_v36 = vadd.f32 %v289_v34, %v288_v32 }
 0x16d   : > { %v284_v37 = vrot.slane %v283_v35, 2  ;;  %v291_v38 = vrot.slane %v290_v36, 2 }
 0x16f   : > { %v285_v39 = vadd.f32 %v284_v37, %v283_v35  ;;  %v292_v40 = vadd.f32 %v291_v38, %v290_v36 }
 0x171   : > { %v286_v41 = vrot.slane %v285_v39, 1  ;;  %v293_v42 = vrot.slane %v292_v40, 1 }
 0x173   : > { %v287_v43 = vadd.f32 %v286_v41, %v285_v39  ;;  %v294_v44 = vadd.f32 %v293_v42, %v292_v40 }
 0x175   : > { %v295_v46 = vadd.f32 %v287_v43, %v278_v45  ;;  %v296_v47 = vadd.f32 %v294_v44, %v278_v45 }
 0x177   : > { %v418_v48 = vmul.f32 -1.442695, %v295_v46  ;;  %v419_v49 = vmul.f32 -1.442695, %v296_v47 }
 0x179   : > { %474 = vpow2.f32 %v418_v48 }
 0x17a   : > { %476 = vpow2.f32 %v419_v49 }
 0x186   : > { %v475_v50 = vpop.eup %474 }
 0x187   : > { %v477_v51 = vpop.eup %476  ;;  %v303_v52 = vadd.f32 1.0, %v475_v50 }
 0x188   : > { %v304_v53 = vadd.f32 1.0, %v477_v51 }
 0x189   : > { %478 = vrcp.f32 %v303_v52 }
 0x18a   : > { %480 = vrcp.f32 %v304_v53 }
 0x196   : > { %v479_v54 = vpop.eup %478 }
 0x197   : > { %v481_v55 = vpop.eup %480  ;;  %v312_v56 = vrot.slane %v479_v54, %v267_v19 }
 0x198   : > { %v316_v57 = vrot.slane %v481_v55, %v267_v19 }
 0x199   : > { %v317_v58 = vmul.f32 %v312_v56, %v716_v0 }
 0x19a   : > { %v318_v59 = vmul.f32 %v316_v57, %v720_v1 }
 0x19c   : > { %v321_v60 = vcombine.low %v317_v58, %v318_v59 }
 0x19e   : > { %323 = vst [vmem:[%s240_s9] sm:$0xff] %v321_v60 }
 0x19f   : > { %523 = shalt.err (!%p520_p10)
}
 0x1a0   : > { %s524_s16 = scalar_lea.hbm %s337_s15, 128  ;;  %s528_s26 = scalar_lea.hbm %s788_s5, 256 }
 0x1a1   : > { %p525_p2 = scmp.ne.s32.totalorder %s337_s15, %s524_s16  ;;  %p529_p7 = scmp.lt.s32.totalorder %s337_s15, %s788_s5 }
 0x1a2   : > { %p530_p0 = scmp.lt.s32.totalorder %s528_s26, %s524_s16 }
 0x1a3   : > { %p526_p4 = pnand %p525_p2, %p799_p12 }
 0x1a4   : > { %p531_p6 = por %p530_p0, %p529_p7 }
 0x1a5   : > { %p527_p9 = pneg %p526_p4 }
 0x1a7   : > { %p532_p11 = pnand %p531_p6, %p527_p9 }
 0x1a9   : > { %535 = shalt.err (!%p532_p11)
}
 0x1aa   : > { %429 = dma.vmem_to_hbm [thread:$0]  (%p799_p12), %s340_s10, 128, %s337_s15, %s325_s12  }
 0x1ab PF: > { %s351_s7 = sand.u32 1, %s562_s18   ;;  %p800_p13 = scmp.ne.s32.totalorder %s794_s6, 0 }
 0x1ac   : > { %p801_p1 = scmp.ge.s32.totalorder %s574_s21, 2  ;;  %s352_s9 = scalar_lea.sflag [#allocation4], %s351_s7 }
 0x1ae   : > { %p436_p3 = pnand %p801_p1, %p800_p13 }
 0x1b0   : > { %p437_p5 = pneg %p436_p3 }
 0x1b2   : > { %557 = dma.done.wait (%p437_p5), %s352_s9, 128  }
 0x1b3   : > { %559 = vsyncadd (%p437_p5), %s352_s9, 4294967168  ;;  %p18_p8 = scmp.ge.s32.totalorder %s633_s24, 4   ;;  %s802_s18 = smov %s566_s19 }
 0x1b4   : > { %s803_s19 = smov %s570_s20  ;;  %s804_s20 = smov %s645_s27 }
 0x1b5   : > { %s805_s21 = smov %s633_s24  ;;  %20 = sbr.rel (!%p18_p8) target bundleno = 5 (0x5), region = 85 }
 0x1ba   :  { %357 = vsyncpa [#allocation3], 1 }
 0x1bb   :  { %359 = vsyncpa [#allocation3 + $0x1], 1 }
 0x1bc   :  { %360 = vsyncpa [#allocation4], 1 }
 0x1bd   :  { %362 = vsyncpa [#allocation4 + $0x1], 1 }

</bundles_post_ra>
